<compile_context>
chip_gen: v7x
topology: tpu7x:2x2x1
jax: 0.10.0
libtpu: 0.0.40
codegen_flags: <defaults>
</compile_context>

<pallas_src>
import math
from functools import partial

import numpy as np
import jax
import jax.numpy as jnp
from jax.experimental import pallas as pl
from jax.experimental.pallas import tpu as pltpu


# ----------------------------- VMEM budget ----------------------------------

def _default_vmem_limit():
    """Scoped-VMEM limit with headroom on every TPU generation.

    v5e/v6e (128 MiB physical) -> 96 MiB; v7x (64 MiB physical) -> 48 MiB.
    Falls back to a conservative 48 MiB if the hardware query is unavailable.
    """
    try:
        info = pltpu.get_tpu_info()
        cap = (getattr(info, "vmem_capacity_bytes", None)
               or getattr(info, "vmem_bytes", None))
        if cap:
            return int(min(cap * 3 // 4, 100 * 1024 * 1024))
    except Exception:
        pass
    return 48 * 1024 * 1024


_VMEM_LIMIT = _default_vmem_limit()

_MM_PARAMS = pltpu.CompilerParams(
    dimension_semantics=("parallel", "parallel", "arbitrary"),
    vmem_limit_bytes=_VMEM_LIMIT,
)


# ----------------------------- tiling helpers -------------------------------

def _pick_tile(dim, target, align):
    """Largest `align`-aligned divisor of `dim` that is <= target, else full dim."""
    if dim <= target:
        return dim
    t = (target // align) * align
    while t >= align:
        if dim % t == 0:
            return t
        t -= align
    # TODO(synk): full-dim fallback can blow the VMEM budget for very long,
    # oddly-sized dims; acceptable for standard Llama shapes.
    return dim


def _row_tile(dim, target):
    """Row (sublane) tile for bf16 operands: 16-aligned if possible, else 8."""
    a = 16 if dim % 16 == 0 else 8
    return _pick_tile(dim, target, a)


# ----------------------------- matmul kernels -------------------------------

def _matmul_kernel(a_ref, b_ref, o_ref, acc_ref):
    @pl.when(pl.program_id(2) == 0)
    def _():
        acc_ref[...] = jnp.zeros_like(acc_ref)

    acc_ref[...] += jnp.dot(a_ref[...], b_ref[...],
                            preferred_element_type=jnp.float32)

    @pl.when(pl.program_id(2) == pl.num_programs(2) - 1)
    def _():
        o_ref[...] = acc_ref[...].astype(o_ref.dtype)


def _matmul_residual_kernel(a_ref, b_ref, r_ref, o_ref, acc_ref):
    @pl.when(pl.program_id(2) == 0)
    def _():
        acc_ref[...] = jnp.zeros_like(acc_ref)

    acc_ref[...] += jnp.dot(a_ref[...], b_ref[...],
                            preferred_element_type=jnp.float32)

    @pl.when(pl.program_id(2) == pl.num_programs(2) - 1)
    def _():
        o_ref[...] = (acc_ref[...] + r_ref[...].astype(jnp.float32)
                      ).astype(o_ref.dtype)


def pallas_matmul(a, b, residual=None, out_dtype=jnp.float32,
                  tm=512, tn=512, tk=1024):
    """C = A @ B (+ residual). A/B fed as bf16, accumulated in f32."""
    M, K = a.shape
    K2, N = b.shape
    assert K == K2
    tm = _row_tile(M, tm)
    tn = _pick_tile(N, tn, 128)
    tk = _pick_tile(K, tk, 128)
    grid = (M // tm, N // tn, K // tk)

    a = a.astype(jnp.bfloat16)
    b = b.astype(jnp.bfloat16)

    in_specs = [pl.BlockSpec((tm, tk), lambda i, j, k: (i, k)),
                pl.BlockSpec((tk, tn), lambda i, j, k: (k, j))]
    operands = [a, b]
    kernel = _matmul_kernel
    if residual is not None:
        in_specs.append(pl.BlockSpec((tm, tn), lambda i, j, k: (i, j)))
        operands.append(residual)
        kernel = _matmul_residual_kernel

    return pl.pallas_call(
        kernel,
        out_shape=jax.ShapeDtypeStruct((M, N), out_dtype),
        grid_spec=pltpu.PrefetchScalarGridSpec(
            num_scalar_prefetch=0,
            grid=grid,
            in_specs=in_specs,
            out_specs=pl.BlockSpec((tm, tn), lambda i, j, k: (i, j)),
            scratch_shapes=[pltpu.VMEM((tm, tn), jnp.float32)],
        ),
        compiler_params=_MM_PARAMS,
    )(*operands)


# ------------------- fused FFN gate/up matmul + SwiGLU ----------------------

def _ffn_gate_kernel(x_ref, w1_ref, w3_ref, o_ref, accg_ref, accu_ref):
    @pl.when(pl.program_id(2) == 0)
    def _():
        accg_ref[...] = jnp.zeros_like(accg_ref)
        accu_ref[...] = jnp.zeros_like(accu_ref)

    x = x_ref[...]
    accg_ref[...] += jnp.dot(x, w1_ref[...], preferred_element_type=jnp.float32)
    accu_ref[...] += jnp.dot(x, w3_ref[...], preferred_element_type=jnp.float32)

    @pl.when(pl.program_id(2) == pl.num_programs(2) - 1)
    def _():
        g = accg_ref[...]
        o_ref[...] = (g * jax.nn.sigmoid(g) * accu_ref[...]).astype(o_ref.dtype)


def pallas_ffn_gate(x, w1, w3, out_dtype=jnp.bfloat16, tm=512, tn=512, tk=1024):
    """silu(x @ w1) * (x @ w3), fused into a single kernel (f32 accumulators)."""
    M, K = x.shape
    _, N = w1.shape
    tm = _row_tile(M, tm)
    tn = _pick_tile(N, tn, 128)
    tk = _pick_tile(K, tk, 128)
    grid = (M // tm, N // tn, K // tk)

    return pl.pallas_call(
        _ffn_gate_kernel,
        out_shape=jax.ShapeDtypeStruct((M, N), out_dtype),
        grid_spec=pltpu.PrefetchScalarGridSpec(
            num_scalar_prefetch=0,
            grid=grid,
            in_specs=[pl.BlockSpec((tm, tk), lambda i, j, k: (i, k)),
                      pl.BlockSpec((tk, tn), lambda i, j, k: (k, j)),
                      pl.BlockSpec((tk, tn), lambda i, j, k: (k, j))],
            out_specs=pl.BlockSpec((tm, tn), lambda i, j, k: (i, j)),
            scratch_shapes=[pltpu.VMEM((tm, tn), jnp.float32),
                            pltpu.VMEM((tm, tn), jnp.float32)],
        ),
        compiler_params=_MM_PARAMS,
    )(x.astype(jnp.bfloat16), w1.astype(jnp.bfloat16), w3.astype(jnp.bfloat16))


# -------------------------------- RMSNorm ------------------------------------

def _rmsnorm_kernel(x_ref, w_ref, o_ref, *, eps):
    x = x_ref[...].astype(jnp.float32)
    ms = jnp.mean(x * x, axis=-1, keepdims=True)
    o_ref[...] = (x * jax.lax.rsqrt(ms + eps) * w_ref[...]).astype(o_ref.dtype)


def pallas_rmsnorm(x2d, w, eps, out_dtype=jnp.bfloat16, tm=512):
    """Row-tiled RMSNorm; emits bf16 so the next matmul reads bf16 directly."""
    M, D = x2d.shape
    tm = _row_tile(M, tm)
    w2d = w.reshape(1, D).astype(jnp.float32)
    return pl.pallas_call(
        partial(_rmsnorm_kernel, eps=eps),
        out_shape=jax.ShapeDtypeStruct((M, D), out_dtype),
        grid=(M // tm,),
        in_specs=[pl.BlockSpec((tm, D), lambda i: (i, 0)),
                  pl.BlockSpec((1, D), lambda i: (0, 0))],
        out_specs=pl.BlockSpec((tm, D), lambda i: (i, 0)),
        compiler_params=pltpu.CompilerParams(
            dimension_semantics=("parallel",),
            vmem_limit_bytes=_VMEM_LIMIT),
    )(x2d, w2d)


# --------------------------- flash attention ---------------------------------

def _flash_attn_kernel(q_ref, k_ref, v_ref, o_ref, m_ref, l_ref, acc_ref,
                       *, scale, tq, tkv, start_pos, n_rep):
    qi = pl.program_id(1)
    ki = pl.program_id(2)

    @pl.when(ki == 0)
    def _():
        m_ref[...] = jnp.full_like(m_ref, -1e30)
        l_ref[...] = jnp.zeros_like(l_ref)
        acc_ref[...] = jnp.zeros_like(acc_ref)

    row_min = qi * tq + start_pos          # smallest visible column bound
    col_lo = ki * tkv
    col_hi = col_lo + tkv - 1
    # Tile has at least one unmasked column (ki==0 always does for causal +
    # start_pos >= 0, so m/l never stay at their init values).
    visible = col_lo <= row_min + (tq - 1)
    # Tile is fully below the causal diagonal -> no masking work needed.
    interior = col_hi <= row_min

    def body(masked):
        k = k_ref[0]                       # [tkv, hd] (bf16)
        v = v_ref[0]                       # [tkv, hd] (bf16)
        if masked:
            row = qi * tq + jax.lax.broadcasted_iota(jnp.int32, (tq, tkv), 0)
            col = ki * tkv + jax.lax.broadcasted_iota(jnp.int32, (tq, tkv), 1)
            keep = col <= row + start_pos   # matches triu(..., diag=start_pos+1)
        # All n_rep query heads of this GQA group share the K/V tile.
        for r in range(n_rep):
            q = q_ref[r]                   # [tq, hd] (bf16)
            s = jax.lax.dot_general(q, k, (((1,), (1,)), ((), ())),
                                    preferred_element_type=jnp.float32) * scale
            if masked:
                s = jnp.where(keep, s, -1e30)
            m_prev = m_ref[r]
            m_new = jnp.maximum(m_prev, jnp.max(s, axis=-1, keepdims=True))
            alpha = jnp.exp(m_prev - m_new)
            p = jnp.exp(s - m_new)         # f32 softmax math (v5e-safe)
            l_ref[r] = alpha * l_ref[r] + jnp.sum(p, axis=-1, keepdims=True)
            acc_ref[r] = alpha * acc_ref[r] + jax.lax.dot_general(
                p.astype(v.dtype), v, (((1,), (0,)), ((), ())),
                preferred_element_type=jnp.float32)
            m_ref[r] = m_new

    @pl.when(interior)
    def _():
        body(masked=False)

    @pl.when(jnp.logical_and(visible, jnp.logical_not(interior)))
    def _():
        body(masked=True)

    @pl.when(ki == pl.num_programs(2) - 1)
    def _():
        for r in range(n_rep):
            # Exact division (runs once per output tile; negligible cost,
            # better parity with the PyTorch reference softmax).
            o_ref[r] = (acc_ref[r] / l_ref[r]).astype(o_ref.dtype)


def pallas_attention(q, k, v, head_dim, n_heads, n_kv_heads, start_pos,
                     out_dtype=jnp.bfloat16, tq=256, tkv=256):
    # q: [B*H, S, hd]; k, v: [B*KV, S, hd].  One grid step handles all n_rep
    # query heads of a GQA group, so each K/V tile is fetched once per group.
    BH, S, hd = q.shape
    n_rep = n_heads // n_kv_heads
    B = BH // n_heads
    tq = _row_tile(S, tq)
    tkv = _pick_tile(S, tkv, 128)
    n_kv_blocks = S // tkv
    grid = (B * n_kv_heads, S // tq, n_kv_blocks)
    scale = 1.0 / math.sqrt(head_dim)

    def q_map(g, qi, ki):
        return (g, qi, 0)

    def kv_map(g, qi, ki):
        # Clamp dead (fully causally-masked) KV tiles onto the last needed
        # tile so Pallas skips their DMA entirely (compute is skipped by the
        # pl.when inside the kernel anyway).
        last = jnp.minimum((qi * tq + (tq - 1) + start_pos) // tkv,
                           n_kv_blocks - 1)
        return (g, jnp.minimum(ki, last), 0)

    return pl.pallas_call(
        partial(_flash_attn_kernel, scale=scale, tq=tq, tkv=tkv,
                start_pos=start_pos, n_rep=n_rep),
        out_shape=jax.ShapeDtypeStruct((BH, S, hd), out_dtype),
        grid_spec=pltpu.PrefetchScalarGridSpec(
            num_scalar_prefetch=0,
            grid=grid,
            in_specs=[pl.BlockSpec((n_rep, tq, hd), q_map),
                      pl.BlockSpec((1, tkv, hd), kv_map),
                      pl.BlockSpec((1, tkv, hd), kv_map)],
            out_specs=pl.BlockSpec((n_rep, tq, hd), q_map),
            scratch_shapes=[pltpu.VMEM((n_rep, tq, 1), jnp.float32),
                            pltpu.VMEM((n_rep, tq, 1), jnp.float32),
                            pltpu.VMEM((n_rep, tq, hd), jnp.float32)],
        ),
        compiler_params=pltpu.CompilerParams(
            dimension_semantics=("parallel", "parallel", "arbitrary"),
            vmem_limit_bytes=_VMEM_LIMIT,
        ),
    )(q.astype(jnp.bfloat16), k.astype(jnp.bfloat16), v.astype(jnp.bfloat16))


# ------------------------------ JAX glue -------------------------------------

def precompute_freqs_cos_sin(dim, end, theta=10000.0):
    freqs = 1.0 / theta ** (np.arange(0, dim, 2)[: dim // 2].astype(np.float32) / dim)
    t = np.arange(end, dtype=np.float32)
    freqs = np.outer(t, freqs)
    return jnp.asarray(np.cos(freqs)), jnp.asarray(np.sin(freqs))


def apply_rotary(x, cos, sin):
    # x: [B, S, H, hd]; cos/sin: [S, hd//2].  Complex multiply on interleaved
    # (real, imag) pairs, matching torch.view_as_complex semantics.  Math is
    # f32-internal; storage stays in the input dtype (bf16).
    # TODO(synk): could be fused into the attention kernel with pltpu.roll
    # (rotate-half layout via weight column permutation); kept as glue here.
    B, S, H, hd = x.shape
    xr = x.astype(jnp.float32).reshape(B, S, H, hd // 2, 2)
    x0, x1 = xr[..., 0], xr[..., 1]
    c = cos[None, :, None, :]
    s = sin[None, :, None, :]
    o0 = x0 * c - x1 * s
    o1 = x0 * s + x1 * c
    return jnp.stack([o0, o1], axis=-1).reshape(B, S, H, hd).astype(x.dtype)


def transformer_block(x, p, cos, sin, start_pos, args):
    B, S, D = x.shape
    H, KV = args["n_heads"], args["n_kv_heads"]
    hd = D // H
    nq, nk = H * hd, KV * hd

    x2 = x.reshape(B * S, D)                                       # f32 residual
    xn = pallas_rmsnorm(x2, p["attn_norm"], args["norm_eps"])      # bf16

    # Fused QKV projection, bf16 output (intermediate only needs bf16).
    qkv = pallas_matmul(xn, p["wqkv"], out_dtype=jnp.bfloat16)
    xq = qkv[:, :nq].reshape(B, S, H, hd)
    xk = qkv[:, nq:nq + nk].reshape(B, S, KV, hd)
    xv = qkv[:, nq + nk:].reshape(B, S, KV, hd)

    xq = apply_rotary(xq, cos, sin)
    xk = apply_rotary(xk, cos, sin)

    # TODO(synk): persistent KV-cache write/read omitted; with start_pos=0 the
    # cached keys/values equal the just-computed ones, matching the reference.
    # TODO(synk): the [B,S,H,hd]->[B*H,S,hd] transposes could be absorbed into
    # the attention BlockSpecs for head_dim>=128; kept explicit so the kernel
    # also lowers at small head_dim.
    q = jnp.transpose(xq, (0, 2, 1, 3)).reshape(B * H, S, hd)
    k = jnp.transpose(xk, (0, 2, 1, 3)).reshape(B * KV, S, hd)
    v = jnp.transpose(xv, (0, 2, 1, 3)).reshape(B * KV, S, hd)

    attn = pallas_attention(q, k, v, hd, H, KV, start_pos)         # bf16
    attn = attn.reshape(B, H, S, hd).transpose(0, 2, 1, 3).reshape(B * S, H * hd)

    # wo projection with the residual add folded into the epilogue.
    h = pallas_matmul(attn, p["wo"], residual=x2, out_dtype=jnp.float32)

    hn = pallas_rmsnorm(h, p["ffn_norm"], args["norm_eps"])        # bf16
    f = pallas_ffn_gate(hn, p["w1"], p["w3"])                      # silu(g)*u, bf16
    out = pallas_matmul(f, p["w2"], residual=h, out_dtype=jnp.float32)
    return out.reshape(B, S, D)


def transformer_forward(params, tokens, start_pos, args):
    B, S = tokens.shape
    D = args["dim"]

    h = params["tok_emb"][tokens]                   # embedding gather (glue)
    cos = params["cos"][start_pos:start_pos + S]
    sin = params["sin"][start_pos:start_pos + S]

    for layer in params["layers"]:
        h = transformer_block(h, layer, cos, sin, start_pos, args)

    hn = pallas_rmsnorm(h.reshape(B * S, D), params["norm_w"], args["norm_eps"])
    # Lane-dense vocab tiling, tall row tile -> fewer re-streams of w_out.
    logits = pallas_matmul(hn, params["w_out"], out_dtype=jnp.float32,
                           tm=512, tn=1024)
    return logits.reshape(B, S, args["vocab_size"])


# --------------------------- parameter init ----------------------------------

def _ffn_hidden_dim(dim, multiple_of, ffn_dim_multiplier=None):
    hidden = 4 * dim
    hidden = int(2 * hidden / 3)
    if ffn_dim_multiplier is not None:
        hidden = int(ffn_dim_multiplier * hidden)
    return multiple_of * ((hidden + multiple_of - 1) // multiple_of)


def init_params(key, args):
    D, H, KV = args["dim"], args["n_heads"], args["n_kv_heads"]
    hd = D // H
    ffn_h = _ffn_hidden_dim(D, args["multiple_of"], args["ffn_dim_multiplier"])
    V = args["vocab_size"]

    def rand(k, shape, dtype=jnp.bfloat16):
        return (jax.random.normal(k, shape, jnp.float32) * 0.02).astype(dtype)

    keys = jax.random.split(key, 2 + 8 * args["n_layers"])
    params = {
        "tok_emb": rand(keys[0], (V, D), jnp.float32),
        "w_out": rand(keys[1], (D, V)),
        "norm_w": jnp.ones((D,), jnp.float32),
        "layers": [],
    }
    cos, sin = precompute_freqs_cos_sin(hd, args["max_seq_len"] * 2)
    params["cos"], params["sin"] = cos, sin

    kidx = 2
    for _ in range(args["n_layers"]):
        lk = keys[kidx:kidx + 8]
        kidx += 8
        wq = rand(lk[0], (D, H * hd))
        wk = rand(lk[1], (D, KV * hd))
        wv = rand(lk[2], (D, KV * hd))
        params["layers"].append({
            "wqkv": jnp.concatenate([wq, wk, wv], axis=1),   # fused QKV weight
            "wo": rand(lk[3], (H * hd, D)),
            "w1": rand(lk[4], (D, ffn_h)),
            "w3": rand(lk[5], (D, ffn_h)),
            "w2": rand(lk[6], (ffn_h, D)),
            "attn_norm": jnp.ones((D,), jnp.float32),
            "ffn_norm": jnp.ones((D,), jnp.float32),
        })
    return params


# --------------------------------- main ---------------------------------------

if __name__ == "__main__":
    args = dict(
        dim=32,
        n_layers=2,
        n_heads=4,
        n_kv_heads=2,
        vocab_size=64,
        multiple_of=16,
        ffn_dim_multiplier=None,
        norm_eps=1e-5,
        max_seq_len=16,
    )

    key = jax.random.PRNGKey(0)
    pkey, tkey = jax.random.split(key)
    params = init_params(pkey, args)

    B, S = 2, 8
    tokens = jax.random.randint(tkey, (B, S), 0, args["vocab_size"], dtype=jnp.int32)

    logits = transformer_forward(params, tokens, start_pos=0, args=args)
    logits = jax.block_until_ready(logits)

    assert logits.shape == (B, S, args["vocab_size"])
    assert bool(jnp.all(jnp.isfinite(logits)))
    print("KERNEL_OK")
</pallas_src>

<mosaic_0001>
module attributes {stable_mosaic.version = 11 : i64} {
  func.func @_rmsnorm_kernel(%arg0: i32, %arg1: memref<16x32xf32, #tpu.memory_space<vmem>>, %arg2: memref<1x32xf32, #tpu.memory_space<vmem>>, %arg3: memref<16x32xbf16, #tpu.memory_space<vmem>>) attributes {dimension_semantics = [#tpu.dimension_semantics<parallel>], iteration_bounds = array<i64: 1>, scalar_prefetch = 0 : i64, scratch_operands = 0 : i64, tpu.core_type = #tpu.core_type<tc>, window_params = [{transform_indices = @transform_0, window_bounds = array<i64: 16, 32>}, {pipeline_mode = #tpu.pipeline_mode<synchronous>, transform_indices = @transform_1, window_bounds = array<i64: 1, 32>}, {transform_indices = @transform_2, window_bounds = array<i64: 16, 32>}]} {
    %c0 = arith.constant 0 : index
    %c0_0 = arith.constant 0 : index
    %0 = vector.load %arg1[%c0, %c0_0] : memref<16x32xf32, #tpu.memory_space<vmem>>, vector<16x32xf32>
    %1 = arith.mulf %0, %0 : vector<16x32xf32>
    %cst = arith.constant dense<0.000000e+00> : vector<16xf32>
    %2 = vector.multi_reduction <add>, %1, %cst [1] : vector<16x32xf32> to vector<16xf32>
    %3 = vector.shape_cast %2 : vector<16xf32> to vector<16x1xf32>
    %cst_1 = arith.constant 3.200000e+01 : f32
    %4 = vector.broadcast %cst_1 : f32 to vector<16x1xf32>
    %5 = arith.divf %3, %4 : vector<16x1xf32>
    %cst_2 = arith.constant 9.99999974E-6 : f32
    %6 = vector.broadcast %cst_2 : f32 to vector<16x1xf32>
    %7 = arith.addf %5, %6 : vector<16x1xf32>
    %8 = math.rsqrt %7 : vector<16x1xf32>
    %9 = vector.broadcast %8 : vector<16x1xf32> to vector<16x32xf32>
    %10 = arith.mulf %0, %9 : vector<16x32xf32>
    %c0_3 = arith.constant 0 : index
    %c0_4 = arith.constant 0 : index
    %11 = vector.load %arg2[%c0_3, %c0_4] : memref<1x32xf32, #tpu.memory_space<vmem>>, vector<1x32xf32>
    %12 = vector.broadcast %11 : vector<1x32xf32> to vector<16x32xf32>
    %13 = arith.mulf %10, %12 : vector<16x32xf32>
    %14 = arith.truncf %13 : vector<16x32xf32> to vector<16x32xbf16>
    %c0_5 = arith.constant 0 : index
    %c0_6 = arith.constant 0 : index
    %15 = vector.load %arg3[%c0_5, %c0_6] : memref<16x32xbf16, #tpu.memory_space<vmem>>, vector<16x32xbf16>
    tpu.vector_store %arg3[%c0_5, %c0_6], %14 {strides = array<i32>} : memref<16x32xbf16, #tpu.memory_space<vmem>>, vector<16x32xbf16>,
    return
  }
  func.func @transform_0(%arg0: i32) -> (i32, i32) {
    %c0_i32 = arith.constant 0 : i32
    %c0_i32_0 = arith.constant 0 : i32
    return %arg0, %c0_i32 : i32, i32
  }
  func.func @transform_1(%arg0: i32) -> (i32, i32) {
    %c0_i32 = arith.constant 0 : i32
    %c0_i32_0 = arith.constant 0 : i32
    %c0_i32_1 = arith.constant 0 : i32
    return %c0_i32, %c0_i32_0 : i32, i32
  }
  func.func @transform_2(%arg0: i32) -> (i32, i32) {
    %c0_i32 = arith.constant 0 : i32
    %c0_i32_0 = arith.constant 0 : i32
    return %arg0, %c0_i32 : i32, i32
  }
}

</mosaic_0001>

<bundles_post_ra>
// kernel: tpu_custom_call.1
= control target key start
LH: loop header
LB: loop body
LE: loop exit
PB: predicated region body
PF: predicated region fallthrough
CT: control target
= control target key end

     0   :  { %7 = vsyncpa [#allocation3], 0  ;;  %s194_s0 = inlined_call_operand.hbm [shape: f32[16,32], index: 0, kind: input, shape index: {}]   ;;  %s195_s1 = inlined_call_operand.vmem [shape: f32[1,32], index: 1, kind: input, shape index: {}]   ;;  %s196_s2 = inlined_call_operand.hbm [shape: bf16[16,32], index: 2, kind: output, shape index: {}]  }
   0x1   :  { %8 = vsyncpa [#allocation4], 0  ;;  %s146_s9 = smov [#allocation2]   ;;  %s98_s13 = scalar_lea.hbm %s194_s0, 256 }
   0x2   :  { %s14_s10 = sshll.u32 %s146_s9, 4  ;;  %p99_p0 = scmp.ne.s32.totalorder %s194_s0, %s98_s13  ;;  %s15_s10 = int_to_ptr.vmem [resolvable:$true] %s14_s10 }
   0x3   :  { %p102_p1 = scmp.lt.u32.totalorder %s98_s13, %s194_s0 }
   0x5   :  { %p104_p2 = pnand %p102_p1, %p99_p0 }
   0x7   :  { %107 = shalt.err (!%p104_p2)
}
   0x8   :  { %s108_s18 = scalar_lea.vmem %s15_s10, 256  ;;  %p113_p4 = scmp.lt.s32.totalorder %s15_s10, %s15_s10 }
   0x9   :  { %p109_p3 = scmp.ne.s32.totalorder %s15_s10, %s108_s18  ;;  %p114_p5 = scmp.lt.s32.totalorder %s108_s18, %s108_s18 }
   0xb   :  { %p115_p6 = por %p114_p5, %p113_p4 }
   0xd   :  { %p116_p7 = pnand %p115_p6, %p109_p3 }
   0xf   :  { %119 = shalt.err (!%p116_p7)
}
  0x10   :  { %s147_s19 = smov 128   ;;  %s148_s20 = smov 8  }
  0x11   :  { %20 = dma.hbm_to_vmem [thread:$0]  %s194_s0, 256, %s15_s10, [#allocation3], %s147_s19, %s147_s19, %s148_s20  }
  0x12   :  { %142 = dma.done.wait [#allocation3], 256  }
  0x13   :  { %143 = vsyncadd [#allocation3], 4294967040  ;;  %v26_v0 = vld [vmem:[#allocation2] sm:$0xff]  ;;  %vm30_vm0 = vcmask 261120   ;;  %v27_v1 = vld [vmem:[#allocation2 + $0x8] sm:$0xff]  ;;  %vm63_vm1 = vcmask 257024  }
  0x14   :  { %v28_v2 = vmul.f32 %v26_v0, %v26_v0  ;;  %v29_v3 = vmul.f32 %v27_v1, %v27_v1  ;;  %v83_v13 = vld [vmem:[%s195_s1] ss:$0 sm:$0xff]  ;;  %s149_s24 = smov [#allocation5]  }
  0x15   :  { %s71_s25 = sshll.u32 %s149_s24, 4  ;;  %s72_s25 = int_to_ptr.vmem [resolvable:$true] %s71_s25 }
  0x16   :  { %v31_v4 = vsel %vm30_vm0, %v28_v2, 0.0  ;;  %v34_v5 = vsel %vm30_vm0, %v29_v3, 0.0  ;;  %s120_s26 = scalar_lea.vmem %s72_s25, 128  ;;  %p125_p9 = scmp.lt.s32.totalorder %s72_s25, %s72_s25 }
  0x17   :  { %32 = vadd.xlane.f32.xlu0 %v31_v4  ;;  %p121_p8 = scmp.ne.s32.totalorder %s72_s25, %s120_s26  ;;  %p126_p10 = scmp.lt.s32.totalorder %s120_s26, %s120_s26 }
  0x19   :  { %p127_p11 = por %p126_p10, %p125_p9 }
  0x1b   :  { %35 = vadd.xlane.f32.xlu0 %v34_v5  ;;  %p128_p12 = pnand %p127_p11, %p121_p8 }
  0xa4   :  { %v33_v6 = vpop.xlane.xlu0 %32 }
  0xa5   :  { %v38_v7 = vmul.f32 0.03125, %v33_v6 }
  0xa7   :  { %v40_v8 = vadd.f32 1e-05, %v38_v7 }
  0xa8   :  { %v36_v9 = vpop.xlane.xlu0 %35 }
  0xa9   :  { %94 = vrsqrt.f32 %v40_v8  ;;  %v39_v10 = vmul.f32 0.03125, %v36_v9 }
  0xab   :  { %v41_v11 = vadd.f32 1e-05, %v39_v10 }
  0xad   :  { %96 = vrsqrt.f32 %v41_v11 }
  0xb3   :  { %v95_v12 = vpop.eup %94 }
  0xb4   :  { %v44_v14 = vmul.f32 %v95_v12, %v26_v0 }
  0xb6   :  { %v53_v15 = vmul.f32 %v83_v13, %v44_v14 }
  0xb7   :  { %v97_v16 = vpop.eup %96 }
  0xb8   :  { %v45_v17 = vmul.f32 %v97_v16, %v27_v1  ;;  %v86_v18 = vpack.c.bf16 %v53_v15, %v53_v15 }
  0xba   :  { %v54_v19 = vmul.f32 %v83_v13, %v45_v17  ;;  %64 = vst.msk [vmem:[#allocation5] sm:$0xf] %vm63_vm1, %v86_v18 }
  0xbc   :  { %v87_v20 = vpack.c.bf16 %v54_v19, %v54_v19 }
  0xbe   :  { %65 = vst.msk [vmem:[#allocation5 + $0x4] sm:$0xf] %vm63_vm1, %v87_v20 }
  0xbf   :  { %131 = shalt.err (!%p128_p12)
}
  0xc0   :  { %s132_s28 = scalar_lea.hbm %s196_s2, 128 }
  0xc1   :  { %p133_p13 = scmp.ne.s32.totalorder %s196_s2, %s132_s28  ;;  %p136_p0 = scmp.lt.u32.totalorder %s132_s28, %s196_s2 }
  0xc3   :  { %p138_p1 = pnand %p136_p0, %p133_p13 }
  0xc5   :  { %141 = shalt.err (!%p138_p1)
}
  0xc6   :  { %s150_s5 = smov 64   ;;  %s151_s6 = smov 4  }
  0xc7   :  { %77 = dma.vmem_to_hbm [thread:$0]  %s72_s25, 128, %s196_s2, [#allocation4], %s150_s5, %s150_s5, %s151_s6  }
  0xc8   :  { %144 = dma.done.wait [#allocation4], 128  }
  0xc9   :  { %145 = vsyncadd [#allocation4], 4294967168 }
  0xca   :  { %81 = vsyncpa [#allocation3], 1 }
  0xcb   :  { %82 = vsyncpa [#allocation4], 1 }

</bundles_post_ra>
